<compile_context>
chip_gen: v7x
topology: tpu7x:2x2x1
jax: 0.10.0
libtpu: 0.0.40
codegen_flags: <defaults>
</compile_context>

<pallas_src>
import functools
import math

import jax
import jax.numpy as jnp
from jax.experimental import pallas as pl
from jax.experimental.pallas import tpu as pltpu

EPS = 1e-6
NEG_INF = -1e9
VMEM_LIMIT = 64 << 20  # raise scoped VMEM (16 MiB default on v5e); still < 64 MiB v7x VMEM


def _round_up(n, m):
    return ((n + m - 1) // m) * m


def _row_tile_for(row_bytes_per_buf, resident_bytes, n_rows, max_row_tile=512):
    """Largest row tile (multiple of 8, <= max_row_tile) whose double-buffered
    in+out traffic plus resident weights stays under ~half the scoped VMEM limit."""
    budget = max(VMEM_LIMIT // 2 - resident_bytes, 8 * row_bytes_per_buf * 2)
    budget_rows = budget // (2 * row_bytes_per_buf)
    tile = max(8, min(max_row_tile, int(budget_rows)) // 8 * 8)
    return min(tile, _round_up(n_rows, 8))


# ----------------------------------------------------------------------------- LayerNorm
def _layernorm_kernel(alpha_ref, bias_ref, x_ref, o_ref):
    # Hoist the SMEM scalar reads out of the vector expression.
    a = alpha_ref[0]
    b = bias_ref[0]
    x = x_ref[...].astype(jnp.float32)
    d = x.shape[-1]
    mean = jnp.mean(x, axis=-1, keepdims=True)
    diff = x - mean
    # torch.std default is unbiased: divide by (N - 1).
    var = jnp.sum(diff * diff, axis=-1, keepdims=True) * jnp.float32(1.0 / (d - 1))
    std = jnp.sqrt(var)
    # eps added to std (torch reference semantics); exact reciprocal keeps tolerance.
    # alpha folded into the per-row scale -> single full-tile multiply + add.
    scale = a * pl.reciprocal(std + jnp.float32(EPS), approx=False)
    o_ref[...] = (diff * scale + b).astype(o_ref.dtype)


def layernorm_pallas(x2d, alpha, bias, *, max_row_tile=512):
    R, D = x2d.shape
    assert D > 1, "unbiased std needs D > 1"
    row_tile = _row_tile_for(4 * D * 2, 0, R, max_row_tile)  # in + out f32 per row
    R_pad = _round_up(R, row_tile)
    xp = jnp.pad(x2d, ((0, R_pad - R), (0, 0))) if R_pad != R else x2d
    out = pl.pallas_call(
        _layernorm_kernel,
        out_shape=jax.ShapeDtypeStruct((R_pad, D), x2d.dtype),
        grid=(R_pad // row_tile,),
        in_specs=[
            pl.BlockSpec(memory_space=pltpu.SMEM),           # alpha (1,)
            pl.BlockSpec(memory_space=pltpu.SMEM),           # bias  (1,)
            pl.BlockSpec((row_tile, D), lambda i: (i, 0)),
        ],
        out_specs=pl.BlockSpec((row_tile, D), lambda i: (i, 0)),
        compiler_params=pltpu.CompilerParams(
            dimension_semantics=("parallel",),
            vmem_limit_bytes=VMEM_LIMIT,
        ),
    )(alpha, bias, xp)
    return out[:R] if R_pad != R else out


# ----------------------------------------------------------------------------- Linear
def _linear_kernel(x_ref, w_ref, b_ref, o_ref, *, relu):
    y = jnp.dot(x_ref[...].astype(jnp.float32), w_ref[...].astype(jnp.float32),
                preferred_element_type=jnp.float32) + b_ref[...]
    if relu:
        y = jnp.maximum(y, 0.0)
    o_ref[...] = y.astype(o_ref.dtype)


def _linear_residual_kernel(x_ref, w_ref, b_ref, res_ref, o_ref):
    y = jnp.dot(x_ref[...].astype(jnp.float32), w_ref[...].astype(jnp.float32),
                preferred_element_type=jnp.float32) + b_ref[...]
    o_ref[...] = (y + res_ref[...].astype(jnp.float32)).astype(o_ref.dtype)


def linear_pallas(x2d, w, b, *, relu=False, residual=None, max_row_tile=512):
    """y = x2d @ w + b [, relu] [, + residual].  w: [Din, Dout], b: [Dout]."""
    R, Din = x2d.shape
    Dout = w.shape[1]
    b2d = b.reshape(1, Dout)
    per_row = 4 * (Din + Dout + (Dout if residual is not None else 0))
    row_tile = _row_tile_for(per_row, 4 * Din * Dout, R, max_row_tile)
    R_pad = _round_up(R, row_tile)
    xp = jnp.pad(x2d, ((0, R_pad - R), (0, 0))) if R_pad != R else x2d

    x_spec = pl.BlockSpec((row_tile, Din), lambda i: (i, 0))
    w_spec = pl.BlockSpec((Din, Dout), lambda i: (0, 0))    # resident across the grid
    b_spec = pl.BlockSpec((1, Dout), lambda i: (0, 0))
    o_spec = pl.BlockSpec((row_tile, Dout), lambda i: (i, 0))
    cp = pltpu.CompilerParams(dimension_semantics=("parallel",),
                              vmem_limit_bytes=VMEM_LIMIT)

    if residual is None:
        out = pl.pallas_call(
            functools.partial(_linear_kernel, relu=relu),
            out_shape=jax.ShapeDtypeStruct((R_pad, Dout), x2d.dtype),
            grid=(R_pad // row_tile,),
            in_specs=[x_spec, w_spec, b_spec],
            out_specs=o_spec,
            compiler_params=cp,
        )(xp, w, b2d)
    else:
        rp = jnp.pad(residual, ((0, R_pad - R), (0, 0))) if R_pad != R else residual
        r_spec = pl.BlockSpec((row_tile, Dout), lambda i: (i, 0))
        out = pl.pallas_call(
            _linear_residual_kernel,
            out_shape=jax.ShapeDtypeStruct((R_pad, Dout), x2d.dtype),
            grid=(R_pad // row_tile,),
            in_specs=[x_spec, w_spec, b_spec, r_spec],
            out_specs=o_spec,
            compiler_params=cp,
        )(xp, w, b2d, rp)
    return out[:R] if R_pad != R else out


# ----------------------------------------------------------------------------- Attention core
def _attention_kernel(q_ref, k_ref, v_ref, m_ref, o_ref, *, scale):
    q = q_ref[0].astype(jnp.float32)   # (Sq, dk)
    k = k_ref[0].astype(jnp.float32)   # (Sk, dk)
    v = v_ref[0].astype(jnp.float32)   # (Sk, dk)
    m = m_ref[0]                       # (Sq, Sk)
    # q @ k^T without materializing a transpose (contract the dk axes).
    s = jax.lax.dot_general(q, k, (((1,), (1,)), ((), ())),
                            preferred_element_type=jnp.float32) * jnp.float32(scale)
    s = jnp.where(m == 0, jnp.float32(NEG_INF), s)
    s = s - jnp.max(s, axis=-1, keepdims=True)
    p = jnp.exp(s)
    p = p * pl.reciprocal(jnp.sum(p, axis=-1, keepdims=True), approx=False)
    o_ref[0] = jnp.dot(p, v, preferred_element_type=jnp.float32).astype(o_ref.dtype)


def attention_pallas(q, k, v, mask):
    """q,k,v: [B, H, S, dk]; mask broadcastable to [B, H, Sq, Sk]."""
    B, H, Sq, dk = q.shape
    Sk = k.shape[2]
    scale = 1.0 / math.sqrt(dk)
    qf = q.reshape(B * H, Sq, dk)
    kf = k.reshape(B * H, Sk, dk)
    vf = v.reshape(B * H, Sk, dk)
    mf = jnp.broadcast_to(mask, (B, H, Sq, Sk)).reshape(B * H, Sq, Sk).astype(jnp.float32)
    out = pl.pallas_call(
        functools.partial(_attention_kernel, scale=scale),
        out_shape=jax.ShapeDtypeStruct((B * H, Sq, dk), q.dtype),
        grid=(B * H,),
        in_specs=[
            pl.BlockSpec((1, Sq, dk), lambda i: (i, 0, 0)),
            pl.BlockSpec((1, Sk, dk), lambda i: (i, 0, 0)),
            pl.BlockSpec((1, Sk, dk), lambda i: (i, 0, 0)),
            pl.BlockSpec((1, Sq, Sk), lambda i: (i, 0, 0)),
        ],
        out_specs=pl.BlockSpec((1, Sq, dk), lambda i: (i, 0, 0)),
        compiler_params=pltpu.CompilerParams(
            dimension_semantics=("parallel",),
            vmem_limit_bytes=VMEM_LIMIT,
        ),
    )(qf, kf, vf, mf)
    return out.reshape(B, H, Sq, dk)


# ----------------------------------------------------------------------------- Module forward
def _mha_context(q_in, k_in, v_in, mask, p):
    """Projections + attention; returns pre-w_o context [B*Sq, D] (w_o fused by caller)."""
    B, Sq, D = q_in.shape
    Sk = k_in.shape[1]
    H = p["h"]
    dk = D // H
    q = linear_pallas(q_in.reshape(B * Sq, D), p["wq"], p["bq"])
    k = linear_pallas(k_in.reshape(B * Sk, D), p["wk"], p["bk"])
    v = linear_pallas(v_in.reshape(B * Sk, D), p["wv"], p["bv"])
    q = q.reshape(B, Sq, H, dk).transpose(0, 2, 1, 3)
    k = k.reshape(B, Sk, H, dk).transpose(0, 2, 1, 3)
    v = v.reshape(B, Sk, H, dk).transpose(0, 2, 1, 3)
    ctx = attention_pallas(q, k, v, mask)                       # [B, H, Sq, dk]
    return ctx.transpose(0, 2, 1, 3).reshape(B * Sq, D)


def decoder_block_forward(x, encoder_output, src_mask, tgt_mask, params):
    """DecoderBlock.forward (eval mode: dropout = identity)."""
    # TODO(synk): training-mode dropout (in residuals, FFN, attention probs) is not
    # implemented; forward pass matches eval() semantics.
    B, S, D = x.shape
    x2d = x.reshape(B * S, D)

    # 1) self-attention residual connection (pre-norm)
    nx = layernorm_pallas(x2d, params["rc0"]["alpha"], params["rc0"]["bias"]).reshape(B, S, D)
    ctx = _mha_context(nx, nx, nx, tgt_mask, params["self_attn"])
    x2d = linear_pallas(ctx, params["self_attn"]["wo"], params["self_attn"]["bo"], residual=x2d)

    # 2) cross-attention residual connection (k/v = raw encoder output, not normed)
    nx = layernorm_pallas(x2d, params["rc1"]["alpha"], params["rc1"]["bias"]).reshape(B, S, D)
    ctx = _mha_context(nx, encoder_output, encoder_output, src_mask, params["cross_attn"])
    x2d = linear_pallas(ctx, params["cross_attn"]["wo"], params["cross_attn"]["bo"], residual=x2d)

    # 3) feed-forward residual connection
    nx2d = layernorm_pallas(x2d, params["rc2"]["alpha"], params["rc2"]["bias"])
    h = linear_pallas(nx2d, params["ffn"]["w1"], params["ffn"]["b1"], relu=True)
    x2d = linear_pallas(h, params["ffn"]["w2"], params["ffn"]["b2"], residual=x2d)

    return x2d.reshape(B, S, D)


# ----------------------------------------------------------------------------- Pure-JAX reference
_HI = jax.lax.Precision.HIGHEST


def _ref_layernorm(x, alpha, bias):
    mean = jnp.mean(x, axis=-1, keepdims=True)
    std = jnp.std(x, axis=-1, keepdims=True, ddof=1)
    return alpha * (x - mean) / (std + EPS) + bias


def _ref_linear(x, w, b):
    return jnp.dot(x, w, precision=_HI) + b


def _ref_mha(q_in, k_in, v_in, mask, p):
    B, Sq, D = q_in.shape
    Sk = k_in.shape[1]
    H = p["h"]
    dk = D // H
    q = _ref_linear(q_in, p["wq"], p["bq"]).reshape(B, Sq, H, dk).transpose(0, 2, 1, 3)
    k = _ref_linear(k_in, p["wk"], p["bk"]).reshape(B, Sk, H, dk).transpose(0, 2, 1, 3)
    v = _ref_linear(v_in, p["wv"], p["bv"]).reshape(B, Sk, H, dk).transpose(0, 2, 1, 3)
    s = jnp.matmul(q, jnp.swapaxes(k, -2, -1), precision=_HI) / math.sqrt(dk)
    s = jnp.where(mask == 0, NEG_INF, s)
    a = jax.nn.softmax(s, axis=-1)
    ctx = jnp.matmul(a, v, precision=_HI).transpose(0, 2, 1, 3).reshape(B, Sq, D)
    return _ref_linear(ctx, p["wo"], p["bo"])


def _ref_decoder_block(x, enc, src_mask, tgt_mask, params):
    nx = _ref_layernorm(x, params["rc0"]["alpha"], params["rc0"]["bias"])
    x = x + _ref_mha(nx, nx, nx, tgt_mask, params["self_attn"])
    nx = _ref_layernorm(x, params["rc1"]["alpha"], params["rc1"]["bias"])
    x = x + _ref_mha(nx, enc, enc, src_mask, params["cross_attn"])
    nx = _ref_layernorm(x, params["rc2"]["alpha"], params["rc2"]["bias"])
    h = jnp.maximum(_ref_linear(nx, params["ffn"]["w1"], params["ffn"]["b1"]), 0.0)
    x = x + _ref_linear(h, params["ffn"]["w2"], params["ffn"]["b2"])
    return x


# ----------------------------------------------------------------------------- init + test
def _init_linear(key, din, dout):
    kw, kb = jax.random.split(key)
    bound = 1.0 / math.sqrt(din)
    w = jax.random.uniform(kw, (din, dout), jnp.float32, -bound, bound)  # stored [in, out]
    b = jax.random.uniform(kb, (dout,), jnp.float32, -bound, bound)
    return w, b


def _init_mha(key, d_model, h):
    ks = jax.random.split(key, 4)
    wq, bq = _init_linear(ks[0], d_model, d_model)
    wk, bk = _init_linear(ks[1], d_model, d_model)
    wv, bv = _init_linear(ks[2], d_model, d_model)
    wo, bo = _init_linear(ks[3], d_model, d_model)
    return {"h": h, "wq": wq, "bq": bq, "wk": wk, "bk": bk,
            "wv": wv, "bv": bv, "wo": wo, "bo": bo}


def _init_layernorm():
    return {"alpha": jnp.ones((1,), jnp.float32), "bias": jnp.zeros((1,), jnp.float32)}


if __name__ == "__main__":
    key = jax.random.PRNGKey(0)
    B, S_tgt, S_src, D, H, D_FF = 2, 8, 8, 32, 4, 64
    ks = jax.random.split(key, 8)

    x = jax.random.normal(ks[0], (B, S_tgt, D), jnp.float32)
    enc = jax.random.normal(ks[1], (B, S_src, D), jnp.float32)
    tgt_mask = jnp.broadcast_to(
        jnp.tril(jnp.ones((S_tgt, S_tgt), jnp.float32))[None, None], (B, 1, S_tgt, S_tgt))
    src_mask = jnp.ones((B, 1, 1, S_src), jnp.float32)

    w1, b1 = _init_linear(ks[4], D, D_FF)
    w2, b2 = _init_linear(ks[5], D_FF, D)
    params = {
        "self_attn": _init_mha(ks[2], D, H),
        "cross_attn": _init_mha(ks[3], D, H),
        "ffn": {"w1": w1, "b1": b1, "w2": w2, "b2": b2},
        "rc0": _init_layernorm(),
        "rc1": _init_layernorm(),
        "rc2": _init_layernorm(),
    }

    out = decoder_block_forward(x, enc, src_mask, tgt_mask, params)
    out = jax.block_until_ready(out)

    ref = _ref_decoder_block(x, enc, src_mask, tgt_mask, params)
    assert out.shape == (B, S_tgt, D)
    err = float(jnp.max(jnp.abs(out - ref)))
    assert jnp.allclose(out, ref, atol=1e-3, rtol=1e-3), f"max abs err {err}"

    print("KERNEL_OK")
</pallas_src>

<mosaic_0001>
module attributes {stable_mosaic.version = 11 : i64} {
  func.func @_layernorm_kernel(%arg0: i32, %arg1: memref<1xf32, #tpu.memory_space<smem>>, %arg2: memref<1xf32, #tpu.memory_space<smem>>, %arg3: memref<16x32xf32, #tpu.memory_space<vmem>>, %arg4: memref<16x32xf32, #tpu.memory_space<vmem>>) attributes {dimension_semantics = [#tpu.dimension_semantics<parallel>], iteration_bounds = array<i64: 1>, scalar_prefetch = 0 : i64, scratch_operands = 0 : i64, tpu.core_type = #tpu.core_type<tc>, window_params = [{transform_indices = @transform_0, window_bounds = array<i64: 1>}, {transform_indices = @transform_1, window_bounds = array<i64: 1>}, {transform_indices = @transform_2, window_bounds = array<i64: 16, 32>}, {transform_indices = @transform_3, window_bounds = array<i64: 16, 32>}]} {
    %c0 = arith.constant 0 : index
    %0 = memref.load %arg1[%c0] : memref<1xf32, #tpu.memory_space<smem>>
    %c0_0 = arith.constant 0 : index
    %1 = memref.load %arg2[%c0_0] : memref<1xf32, #tpu.memory_space<smem>>
    %c0_1 = arith.constant 0 : index
    %c0_2 = arith.constant 0 : index
    %2 = vector.load %arg3[%c0_1, %c0_2] : memref<16x32xf32, #tpu.memory_space<vmem>>, vector<16x32xf32>
    %cst = arith.constant dense<0.000000e+00> : vector<16xf32>
    %3 = vector.multi_reduction <add>, %2, %cst [1] : vector<16x32xf32> to vector<16xf32>
    %4 = vector.shape_cast %3 : vector<16xf32> to vector<16x1xf32>
    %cst_3 = arith.constant 3.200000e+01 : f32
    %5 = vector.broadcast %cst_3 : f32 to vector<16x1xf32>
    %6 = arith.divf %4, %5 : vector<16x1xf32>
    %7 = vector.broadcast %6 : vector<16x1xf32> to vector<16x32xf32>
    %8 = arith.subf %2, %7 : vector<16x32xf32>
    %9 = arith.mulf %8, %8 : vector<16x32xf32>
    %cst_4 = arith.constant dense<0.000000e+00> : vector<16xf32>
    %10 = vector.multi_reduction <add>, %9, %cst_4 [1] : vector<16x32xf32> to vector<16xf32>
    %11 = vector.shape_cast %10 : vector<16xf32> to vector<16x1xf32>
    %cst_5 = arith.constant 0.0322580636 : f32
    %12 = vector.broadcast %cst_5 : f32 to vector<16x1xf32>
    %13 = arith.mulf %11, %12 : vector<16x1xf32>
    %14 = math.sqrt %13 : vector<16x1xf32>
    %cst_6 = arith.constant 9.99999997E-7 : f32
    %15 = vector.broadcast %cst_6 : f32 to vector<16x1xf32>
    %16 = arith.addf %14, %15 : vector<16x1xf32>
    %17 = tpu.reciprocal %16 : vector<16x1xf32> -> vector<16x1xf32>
    %18 = vector.broadcast %0 : f32 to vector<16x1xf32>
    %19 = arith.mulf %18, %17 : vector<16x1xf32>
    %20 = vector.broadcast %19 : vector<16x1xf32> to vector<16x32xf32>
    %21 = arith.mulf %8, %20 : vector<16x32xf32>
    %22 = vector.broadcast %1 : f32 to vector<16x32xf32>
    %23 = arith.addf %21, %22 : vector<16x32xf32>
    %c0_7 = arith.constant 0 : index
    %c0_8 = arith.constant 0 : index
    %24 = vector.load %arg4[%c0_7, %c0_8] : memref<16x32xf32, #tpu.memory_space<vmem>>, vector<16x32xf32>
    tpu.vector_store %arg4[%c0_7, %c0_8], %23 {strides = array<i32>} : memref<16x32xf32, #tpu.memory_space<vmem>>, vector<16x32xf32>,
    return
  }
  func.func @transform_0(%arg0: i32) -> i32 {
    %c0_i32 = arith.constant 0 : i32
    %c0_i32_0 = arith.constant 0 : i32
    return %c0_i32 : i32
  }
  func.func @transform_1(%arg0: i32) -> i32 {
    %c0_i32 = arith.constant 0 : i32
    %c0_i32_0 = arith.constant 0 : i32
    return %c0_i32 : i32
  }
  func.func @transform_2(%arg0: i32) -> (i32, i32) {
    %c0_i32 = arith.constant 0 : i32
    %c0_i32_0 = arith.constant 0 : i32
    return %arg0, %c0_i32 : i32, i32
  }
  func.func @transform_3(%arg0: i32) -> (i32, i32) {
    %c0_i32 = arith.constant 0 : i32
    %c0_i32_0 = arith.constant 0 : i32
    return %arg0, %c0_i32 : i32, i32
  }
}

</mosaic_0001>

<bundles_post_ra>
// kernel: tpu_custom_call.1
= control target key start
LH: loop header
LB: loop body
LE: loop exit
PB: predicated region body
PF: predicated region fallthrough
CT: control target
= control target key end

     0   :  { %10 = vsyncpa [#allocation5], 0  ;;  %s228_s0 = inlined_call_operand.<no memory space> [shape: f32[1], index: 0, kind: input, shape index: {}]   ;;  %s229_s1 = inlined_call_operand.<no memory space> [shape: f32[1], index: 1, kind: input, shape index: {}]   ;;  %s230_s2 = inlined_call_operand.hbm [shape: f32[16,32], index: 2, kind: input, shape index: {}]   ;;  %s231_s3 = inlined_call_operand.hbm [shape: f32[16,32], index: 3, kind: output, shape index: {}]  }
   0x1   :  { %11 = vsyncpa [#allocation6], 0  ;;  %s162_s12 = smov [#allocation4]   ;;  %s114_s16 = scalar_lea.hbm %s230_s2, 256 }
   0x2   :  { %s21_s13 = sshll.u32 %s162_s12, 4  ;;  %p115_p0 = scmp.ne.s32.totalorder %s230_s2, %s114_s16  ;;  %s22_s13 = int_to_ptr.vmem [resolvable:$true] %s21_s13 }
   0x3   :  { %p118_p1 = scmp.lt.u32.totalorder %s114_s16, %s230_s2 }
   0x5   :  { %p120_p2 = pnand %p118_p1, %p115_p0 }
   0x7   :  { %123 = shalt.err (!%p120_p2)
}
   0x8   :  { %s124_s21 = scalar_lea.vmem %s22_s13, 256  ;;  %p129_p4 = scmp.lt.s32.totalorder %s22_s13, %s22_s13 }
   0x9   :  { %p125_p3 = scmp.ne.s32.totalorder %s22_s13, %s124_s21  ;;  %p130_p5 = scmp.lt.s32.totalorder %s124_s21, %s124_s21 }
   0xb   :  { %p131_p6 = por %p130_p5, %p129_p4 }
   0xd   :  { %p132_p7 = pnand %p131_p6, %p125_p3 }
   0xf   :  { %135 = shalt.err (!%p132_p7)
}
  0x10   :  { %s163_s22 = smov 128   ;;  %s164_s23 = smov 8  }
  0x11   :  { %27 = dma.hbm_to_vmem [thread:$0]  %s230_s2, 256, %s22_s13, [#allocation5], %s163_s22, %s163_s22, %s164_s23  }
  0x12   :  { %158 = dma.done.wait [#allocation5], 256  }
  0x13   :  { %159 = vsyncadd [#allocation5], 4294967040  ;;  %vm35_vm0 = vcmask 261120   ;;  %v33_v0 = vld [vmem:[#allocation4] sm:$0xff]  ;;  %v34_v1 = vld [vmem:[#allocation4 + $0x8] sm:$0xff]  ;;  %v75_v30 = vstv %s228_s0  ;;  %v80_v33 = vstv %s229_s1  ;;  %s165_s29 = smov [#allocation7]  }
  0x14   :  { %v36_v2 = vsel %vm35_vm0, %v33_v0, 0.0  ;;  %v39_v3 = vsel %vm35_vm0, %v34_v1, 0.0  ;;  %s90_s30 = sshll.u32 %s165_s29, 4  ;;  %s91_s30 = int_to_ptr.vmem [resolvable:$true] %s90_s30 }
  0x15   :  { %37 = vadd.xlane.f32.xlu0 %v36_v2  ;;  %s136_s0 = scalar_lea.vmem %s91_s30, 256  ;;  %p141_p9 = scmp.lt.s32.totalorder %s91_s30, %s91_s30 }
  0x16   :  { %p137_p8 = scmp.ne.s32.totalorder %s91_s30, %s136_s0  ;;  %p142_p10 = scmp.lt.s32.totalorder %s136_s0, %s136_s0 }
  0x18   :  { %p143_p11 = por %p142_p10, %p141_p9 }
  0x19   :  { %40 = vadd.xlane.f32.xlu0 %v39_v3 }
  0x1a   :  { %p144_p12 = pnand %p143_p11, %p137_p8 }
  0xa2   :  { %v38_v4 = vpop.xlane.xlu0 %37 }
  0xa3   :  { %v43_v5 = vmul.f32 0.03125, %v38_v4 }
  0xa5   :  { %v45_v6 = vsub.f32 %v33_v0, %v43_v5 }
  0xa6   :  { %v41_v7 = vpop.xlane.xlu0 %40 }
  0xa7   :  { %v44_v8 = vmul.f32 0.03125, %v41_v7  ;;  %v47_v9 = vmul.f32 %v45_v6, %v45_v6 }
  0xa9   :  { %v46_v10 = vsub.f32 %v34_v1, %v44_v8  ;;  %v49_v11 = vsel %vm35_vm0, %v47_v9, 0.0 }
  0xaa   :  { %50 = vadd.xlane.f32.xlu1 %v49_v11 }
  0xab   :  { %v48_v12 = vmul.f32 %v46_v10, %v46_v10 }
  0xad   :  { %v52_v13 = vsel %vm35_vm0, %v48_v12, 0.0 }
  0xae   :  { %53 = vadd.xlane.f32.xlu1 %v52_v13 }
 0x137   :  { %v51_v14 = vpop.xlane.xlu1 %50 }
 0x138   :  { %v55_v15 = vmul.f32 0.032258064, %v51_v14 }
 0x13a   :  { %106 = vrsqrt.f32 %v55_v15  ;;  %vm59_vm1 = vcmp.eq.f32.partialorder %v55_v15, inf  ;;  %v62_v20 = vand.u32 2147483648, %v55_v15  ;;  %vm61_vm2 = vcmp.eq.f32.partialorder %v55_v15, 0.0 }
 0x13b   :  { %v54_v16 = vpop.xlane.xlu1 %53 }
 0x13c   :  { %v56_v17 = vmul.f32 0.032258064, %v54_v16 }
 0x13e   :  { %108 = vrsqrt.f32 %v56_v17  ;;  %vm66_vm3 = vcmp.eq.f32.partialorder %v56_v17, inf  ;;  %v69_v26 = vand.u32 2147483648, %v56_v17  ;;  %vm68_vm4 = vcmp.eq.f32.partialorder %v56_v17, 0.0 }
 0x144   :  { %v107_v18 = vpop.eup %106 }
 0x145   :  { %v58_v19 = vmul.f32 %v107_v18, %v55_v15 }
 0x147   :  { %v60_v21 = vsel %vm59_vm1, %v55_v15, %v58_v19 }
 0x148   :  { %v109_v22 = vpop.eup %108  ;;  %v63_v23 = vsel %vm61_vm2, %v62_v20, %v60_v21 }
 0x149   :  { %v71_v24 = vadd.f32 1e-06, %v63_v23  ;;  %v65_v25 = vmul.f32 %v109_v22, %v56_v17 }
 0x14b   :  { %110 = vrcp.f32 %v71_v24  ;;  %v67_v27 = vsel %vm66_vm3, %v56_v17, %v65_v25 }
 0x14c   :  { %v70_v28 = vsel %vm68_vm4, %v69_v26, %v67_v27 }
 0x14d   :  { %v72_v29 = vadd.f32 1e-06, %v70_v28 }
 0x14f   :  { %112 = vrcp.f32 %v72_v29 }
 0x155   :  { %v111_v31 = vpop.eup %110 }
 0x156   :  { %v76_v32 = vmul.f32 %v111_v31, %v75_v30 }
 0x158   :  { %v78_v34 = vmul.f32 %v76_v32, %v45_v6 }
 0x159   :  { %v113_v35 = vpop.eup %112 }
 0x15a   :  { %v77_v36 = vmul.f32 %v113_v35, %v75_v30  ;;  %v81_v37 = vadd.f32 %v80_v33, %v78_v34 }
 0x15c   :  { %v79_v38 = vmul.f32 %v77_v36, %v46_v10  ;;  %83 = vst.msk [vmem:[#allocation7] sm:$0xff] %vm35_vm0, %v81_v37 }
 0x15e   :  { %v82_v39 = vadd.f32 %v80_v33, %v79_v38 }
 0x160   :  { %84 = vst.msk [vmem:[#allocation7 + $0x8] sm:$0xff] %vm35_vm0, %v82_v39 }
 0x161   :  { %147 = shalt.err (!%p144_p12)
}
 0x162   :  { %s148_s5 = scalar_lea.hbm %s231_s3, 256 }
 0x163   :  { %p149_p13 = scmp.ne.s32.totalorder %s231_s3, %s148_s5  ;;  %p152_p0 = scmp.lt.u32.totalorder %s148_s5, %s231_s3 }
 0x165   :  { %p154_p1 = pnand %p152_p0, %p149_p13 }
 0x167   :  { %157 = shalt.err (!%p154_p1)
}
 0x168   :  { %96 = dma.vmem_to_hbm [thread:$0]  %s91_s30, 256, %s231_s3, [#allocation6], %s163_s22, %s163_s22, %s164_s23  }
 0x169   :  { %160 = dma.done.wait [#allocation6], 256  }
 0x16a   :  { %161 = vsyncadd [#allocation6], 4294967040 }
 0x16b   :  { %100 = vsyncpa [#allocation5], 1 }
 0x16c   :  { %101 = vsyncpa [#allocation6], 1 }

</bundles_post_ra>
